<compile_context>
chip_gen: v5e
topology: v5e:2x2
jax: 0.10.0
libtpu: 0.0.40
codegen_flags: <defaults>
</compile_context>

<pallas_src>
import numpy as np
import jax
import jax.numpy as jnp
from jax.experimental import pallas as pl
from jax.experimental.pallas import tpu as pltpu

_VMEM_LIMIT_BYTES = 48 * 1024 * 1024   # <= physical VMEM on every current chip
_TILE_TARGET_BYTES = 2 * 1024 * 1024   # target *physical* bytes per output tile
_UNROLL_CAP = 16                       # max statically unrolled copies per grid step


def _chunk_geometry(T: int, chunk_size: int, step_size: int):
    """pad_len / padded_T / S exactly as in the torch module (T >= chunk_size assumed)."""
    n_hops = -(-(T - chunk_size) // step_size)          # ceil((T - chunk) / step)
    padded_T = chunk_size + step_size * n_hops
    pad_len = padded_T - T                               # 0 <= pad_len < step_size
    S = (padded_T - chunk_size) // step_size + 1
    return pad_len, padded_T, S


def _divisors(n: int):
    out = set()
    d = 1
    while d * d <= n:
        if n % d == 0:
            out.add(d)
            out.add(n // d)
        d += 1
    return sorted(out)


def _sublane_multiple(dtype) -> int:
    # sub-32-bit dtypes pack rows along sublanes: 8 for f32, 16 for bf16, 32 for int8/fp8
    itemsize = jnp.dtype(dtype).itemsize
    return max(1, (8 * 4) // itemsize)


def _phys_tile_bytes(sublanes: int, lanes: int, dtype) -> int:
    """VMEM footprint of a (sublanes, lanes) tile after (8,128)-style tiling/padding."""
    itemsize = jnp.dtype(dtype).itemsize
    sub = _sublane_multiple(dtype)
    return (-(-sublanes // sub) * sub) * (-(-lanes // 128) * 128) * itemsize


def _dim_semantics(B: int):
    # v7x megacore: prefer splitting the batch axis (disjoint per-core input slabs);
    # expose the S-block axis as parallel only when there is a single batch.
    return ("parallel", "arbitrary") if B > 1 else ("parallel", "parallel")


def _pick_s_block_general(S, chunk_size, C, dtype, s_block):
    """Largest divisor of S whose physical output tile fits the byte target."""
    limit = S if s_block is None else max(1, min(int(s_block), S))
    per_chunk = _phys_tile_bytes(chunk_size, C, dtype)
    best = 1
    for d in _divisors(S):
        if d <= limit and d * per_chunk <= _TILE_TARGET_BYTES:
            best = max(best, d)
    return best


def _pick_s_block_rowgroup(S, R, W, dtype, s_block):
    """Divisor of S for the row-group path; prefer sublane-aligned output blocks."""
    limit = S if s_block is None else max(1, min(int(s_block), S))
    sub = _sublane_multiple(dtype)
    cands = [d for d in _divisors(S)
             if d <= limit and _phys_tile_bytes(d * R, W, dtype) <= _TILE_TARGET_BYTES]
    if not cands:
        return 1
    aligned = [d for d in cands if d == S or (d * R) % sub == 0]
    return max(aligned) if aligned else max(cands)


def _make_chunk_general(x: jax.Array, chunk_size: int, step_size: int, s_block) -> jax.Array:
    """Default path: raw (B, T, C) input (no wrapper pad), per-chunk (chunk, C) tile
    copies, static in-kernel zero fill of the single partial tail chunk."""
    B, T, C = x.shape
    pad_len, _, S = _chunk_geometry(T, chunk_size, step_size)
    S_BLK = _pick_s_block_general(S, chunk_size, C, x.dtype, s_block)
    num_sb = S // S_BLK                                   # S_BLK divides S: no grid padding

    # Only the last chunk (s == S - 1) can be partial (T >= chunk_size, pad_len < step).
    start_last = (S - 1) * step_size
    n_valid_last = max(0, min(chunk_size, T - start_last))

    def kernel(x_ref, o_ref):
        # x_ref: (T, C) full time slab of the current batch (batch dim squeezed)
        # o_ref: (S_BLK, chunk_size, C) output tile for this S-block
        sb = pl.program_id(1)
        base = sb * S_BLK

        def copy_full(j):
            o_ref[j] = x_ref[pl.ds((base + j) * step_size, chunk_size), :]

        def emit_full(n):                       # chunks j = 0 .. n-1 are all full
            if n <= 0:
                return
            if n <= _UNROLL_CAP:
                for j in range(n):
                    copy_full(j)
            else:
                @pl.loop(0, n)
                def _(j):
                    copy_full(j)

        def emit_last_block():                  # S_BLK - 1 full chunks + 1 tail chunk
            emit_full(S_BLK - 1)
            jt = S_BLK - 1
            if n_valid_last > 0:                # static slices only
                o_ref[jt, :n_valid_last, :] = x_ref[start_last:start_last + n_valid_last, :]
            o_ref[jt, n_valid_last:, :] = jnp.zeros(
                (chunk_size - n_valid_last, C), o_ref.dtype)

        if pad_len == 0:
            emit_full(S_BLK)                    # guard-free fast path: every chunk is full
        elif num_sb == 1:
            emit_last_block()
        else:
            @pl.when(sb != num_sb - 1)
            def _():
                emit_full(S_BLK)

            @pl.when(sb == num_sb - 1)
            def _():
                emit_last_block()

    return pl.pallas_call(
        kernel,
        out_shape=jax.ShapeDtypeStruct((B, S, chunk_size, C), x.dtype),
        grid=(B, num_sb),
        in_specs=[pl.BlockSpec((None, T, C), lambda b, sb: (b, 0, 0))],
        out_specs=pl.BlockSpec((None, S_BLK, chunk_size, C), lambda b, sb: (b, sb, 0, 0)),
        compiler_params=pltpu.CompilerParams(
            dimension_semantics=_dim_semantics(B),
            vmem_limit_bytes=_VMEM_LIMIT_BYTES,
        ),
    )(x)


def _make_chunk_rowgroup(x: jax.Array, chunk_size: int, step_size: int, s_block) -> jax.Array:
    """chunk % step == 0 and C < 128: lane-dense copies of (step*C)-wide row groups."""
    B, T, C = x.shape
    pad_len, padded_T, S = _chunk_geometry(T, chunk_size, step_size)
    R = chunk_size // step_size                  # row-groups per chunk
    W = step_size * C                            # lane width of one row-group
    nrows_in = padded_T // step_size
    S_BLK = _pick_s_block_rowgroup(S, R, W, x.dtype, s_block)
    num_sb = S // S_BLK                          # S_BLK divides S: no grid padding

    # TODO(synk): the wrapper pad is one extra full HBM copy of x when pad_len > 0; an
    # in-kernel tail fill would need a sublane->lane relayout (or flat manual DMA).
    if pad_len:
        x = jnp.pad(x, ((0, 0), (0, pad_len), (0, 0)))
    xv = x.reshape(B, nrows_in, W)               # contiguous (free) reshape

    def kernel(x_ref, o_ref):
        # x_ref: (nrows_in, W) row-group slab of the current batch (batch dim squeezed)
        # o_ref: (S_BLK * R, W) lane-dense output tile for this S-block
        base = pl.program_id(1) * S_BLK

        def copy_chunk(j):                       # chunk base+j == input row-groups [base+j, base+j+R)
            o_ref[pl.ds(j * R, R), :] = x_ref[pl.ds(base + j, R), :]

        if S_BLK <= _UNROLL_CAP:
            for j in range(S_BLK):
                copy_chunk(j)
        else:
            @pl.loop(0, S_BLK)
            def _(j):
                copy_chunk(j)

    out = pl.pallas_call(
        kernel,
        out_shape=jax.ShapeDtypeStruct((B, S * R, W), x.dtype),
        grid=(B, num_sb),
        in_specs=[pl.BlockSpec((None, nrows_in, W), lambda b, sb: (b, 0, 0))],
        out_specs=pl.BlockSpec((None, S_BLK * R, W), lambda b, sb: (b, sb, 0)),
        compiler_params=pltpu.CompilerParams(
            dimension_semantics=_dim_semantics(B),
            vmem_limit_bytes=_VMEM_LIMIT_BYTES,
        ),
    )(xv)
    return out.reshape(B, S, chunk_size, C)      # free reshape (undoes the row-group view)


def make_chunk(x: jax.Array, chunk_size: int, step_size: int, *, s_block=None) -> jax.Array:
    """MakeChunk.forward: x (B, T, C) -> (B, S, chunk_size, C)."""
    B, T, C = x.shape
    assert T >= chunk_size, "MakeChunk expects T >= chunk_size"
    pad_len, padded_T, S = _chunk_geometry(T, chunk_size, step_size)

    if chunk_size == step_size:
        # Non-overlapping: pure pad + reshape layout op -> no kernel launch.
        xp = jnp.pad(x, ((0, 0), (0, pad_len), (0, 0))) if pad_len else x
        return xp.reshape(B, S, chunk_size, C)

    if chunk_size % step_size == 0 and C < 128:
        # Small-C case: (step*C)-lane row-group copies beat C-lane stores.
        return _make_chunk_rowgroup(x, chunk_size, step_size, s_block)

    # Default path: already lane-dense for C >= 128, no wrapper pad, in-kernel tail fill.
    # TODO(synk): when C < 128 and chunk % step != 0 stores stay C lanes wide; fixing that
    # needs an in-kernel (chunk, C) -> (1, chunk*C) relayout through the XLU.
    return _make_chunk_general(x, chunk_size, step_size, s_block)


def make_chunk_ref(x: np.ndarray, chunk_size: int, step_size: int) -> np.ndarray:
    """Pure numpy reference matching the PyTorch module semantics."""
    B, T, C = x.shape
    pad_len, padded_T, S = _chunk_geometry(T, chunk_size, step_size)
    xp = np.pad(x, ((0, 0), (0, pad_len), (0, 0)))
    return np.stack(
        [xp[:, s * step_size:s * step_size + chunk_size, :] for s in range(S)], axis=1)


if __name__ == "__main__":
    key = jax.random.PRNGKey(0)

    def check(x, chunk, step, **kw):
        out = jax.block_until_ready(make_chunk(x, chunk, step, **kw))
        ref = make_chunk_ref(np.asarray(x), chunk, step)
        assert out.shape == ref.shape, (out.shape, ref.shape)
        np.testing.assert_array_equal(np.asarray(out), ref)

    # Row-group (lane-dense) path: chunk % step == 0, C < 128.
    x1 = jax.random.normal(key, (2, 37, 8), dtype=jnp.float32)            # pad_len=3, S=9
    check(x1, 8, 4)                  # single S-block (S_BLK = 9)
    check(x1, 8, 4, s_block=3)       # 3 S-blocks of 3 chunks, no grid padding
    x1b = jax.random.normal(jax.random.fold_in(key, 1), (2, 36, 8), dtype=jnp.float32)
    check(x1b, 8, 4)                 # pad_len = 0 -> no wrapper pad at all
    check(x1b, 8, 4, s_block=2)      # 4 S-blocks of 2 chunks

    # General path: chunk % step != 0 (raw input, static in-kernel tail fill).
    x2 = jax.random.normal(jax.random.fold_in(key, 2), (2, 19, 8), dtype=jnp.float32)
    check(x2, 6, 4)                  # pad_len=3, S=5, single S-block containing the tail
    check(x2, 6, 4, s_block=2)       # S_BLK snaps to divisor 1 -> 5 S-blocks
    x2b = jax.random.normal(jax.random.fold_in(key, 3), (2, 18, 8), dtype=jnp.float32)
    check(x2b, 6, 4)                 # pad_len = 0 -> guard-free fast path
    x2c = jax.random.normal(jax.random.fold_in(key, 4), (2, 81, 8), dtype=jnp.float32)
    check(x2c, 6, 4)                 # S=20 > unroll cap -> pl.loop body + tail chunk

    # General path with lane-dense C (chunk % step == 0 but C >= 128 -> no wrapper pad).
    x3 = jax.random.normal(jax.random.fold_in(key, 5), (2, 37, 128), dtype=jnp.float32)
    check(x3, 8, 4)

    # Non-overlapping fast path (chunk == step): pad + reshape, no Pallas.
    check(x1, 8, 8)

    print("KERNEL_OK")
</pallas_src>

<mosaic_0001>
module attributes {stable_mosaic.version = 11 : i64} {
  func.func @kernel(%arg0: i32, %arg1: i32, %arg2: memref<1x10x32xf32, #tpu.memory_space<vmem>>, %arg3: memref<1x18x32xf32, #tpu.memory_space<vmem>>) attributes {dimension_semantics = [#tpu.dimension_semantics<parallel>, #tpu.dimension_semantics<arbitrary>], iteration_bounds = array<i64: 2, 1>, scalar_prefetch = 0 : i64, scratch_operands = 0 : i64, tpu.core_type = #tpu.core_type<tc>, window_params = [{transform_indices = @transform_0, window_bounds = array<i64: 1, 10, 32>}, {transform_indices = @transform_1, window_bounds = array<i64: 1, 18, 32>}]} {
    %c9_i32 = arith.constant 9 : i32
    %0 = arith.muli %arg1, %c9_i32 : i32
    %c0_i32 = arith.constant 0 : i32
    %1 = arith.addi %0, %c0_i32 : i32
    %c0 = arith.constant 0 : index
    %2 = arith.index_cast %1 : i32 to index
    %c0_0 = arith.constant 0 : index
    %3 = vector.load %arg2[%c0, %2, %c0_0] : memref<1x10x32xf32, #tpu.memory_space<vmem>>, vector<1x2x32xf32>
    %4 = vector.shape_cast %3 : vector<1x2x32xf32> to vector<2x32xf32>
    %c0_1 = arith.constant 0 : index
    %c0_2 = arith.constant 0 : index
    %c0_3 = arith.constant 0 : index
    %5 = vector.load %arg3[%c0_1, %c0_2, %c0_3] : memref<1x18x32xf32, #tpu.memory_space<vmem>>, vector<1x2x32xf32>
    %6 = vector.shape_cast %5 : vector<1x2x32xf32> to vector<2x32xf32>
    %7 = vector.shape_cast %4 : vector<2x32xf32> to vector<1x2x32xf32>
    tpu.vector_store %arg3[%c0_1, %c0_2, %c0_3], %7 {strides = array<i32>} : memref<1x18x32xf32, #tpu.memory_space<vmem>>, vector<1x2x32xf32>,
    %c1_i32 = arith.constant 1 : i32
    %8 = arith.addi %0, %c1_i32 : i32
    %c0_4 = arith.constant 0 : index
    %9 = arith.index_cast %8 : i32 to index
    %c0_5 = arith.constant 0 : index
    %10 = vector.load %arg2[%c0_4, %9, %c0_5] : memref<1x10x32xf32, #tpu.memory_space<vmem>>, vector<1x2x32xf32>
    %11 = vector.shape_cast %10 : vector<1x2x32xf32> to vector<2x32xf32>
    %c0_6 = arith.constant 0 : index
    %c2 = arith.constant 2 : index
    %c0_7 = arith.constant 0 : index
    %12 = vector.load %arg3[%c0_6, %c2, %c0_7] : memref<1x18x32xf32, #tpu.memory_space<vmem>>, vector<1x2x32xf32>
    %13 = vector.shape_cast %12 : vector<1x2x32xf32> to vector<2x32xf32>
    %14 = vector.shape_cast %11 : vector<2x32xf32> to vector<1x2x32xf32>
    tpu.vector_store %arg3[%c0_6, %c2, %c0_7], %14 {strides = array<i32>} : memref<1x18x32xf32, #tpu.memory_space<vmem>>, vector<1x2x32xf32>,
    %c2_i32 = arith.constant 2 : i32
    %15 = arith.addi %0, %c2_i32 : i32
    %c0_8 = arith.constant 0 : index
    %16 = arith.index_cast %15 : i32 to index
    %c0_9 = arith.constant 0 : index
    %17 = vector.load %arg2[%c0_8, %16, %c0_9] : memref<1x10x32xf32, #tpu.memory_space<vmem>>, vector<1x2x32xf32>
    %18 = vector.shape_cast %17 : vector<1x2x32xf32> to vector<2x32xf32>
    %c0_10 = arith.constant 0 : index
    %c4 = arith.constant 4 : index
    %c0_11 = arith.constant 0 : index
    %19 = vector.load %arg3[%c0_10, %c4, %c0_11] : memref<1x18x32xf32, #tpu.memory_space<vmem>>, vector<1x2x32xf32>
    %20 = vector.shape_cast %19 : vector<1x2x32xf32> to vector<2x32xf32>
    %21 = vector.shape_cast %18 : vector<2x32xf32> to vector<1x2x32xf32>
    tpu.vector_store %arg3[%c0_10, %c4, %c0_11], %21 {strides = array<i32>} : memref<1x18x32xf32, #tpu.memory_space<vmem>>, vector<1x2x32xf32>,
    %c3_i32 = arith.constant 3 : i32
    %22 = arith.addi %0, %c3_i32 : i32
    %c0_12 = arith.constant 0 : index
    %23 = arith.index_cast %22 : i32 to index
    %c0_13 = arith.constant 0 : index
    %24 = vector.load %arg2[%c0_12, %23, %c0_13] : memref<1x10x32xf32, #tpu.memory_space<vmem>>, vector<1x2x32xf32>
    %25 = vector.shape_cast %24 : vector<1x2x32xf32> to vector<2x32xf32>
    %c0_14 = arith.constant 0 : index
    %c6 = arith.constant 6 : index
    %c0_15 = arith.constant 0 : index
    %26 = vector.load %arg3[%c0_14, %c6, %c0_15] : memref<1x18x32xf32, #tpu.memory_space<vmem>>, vector<1x2x32xf32>
    %27 = vector.shape_cast %26 : vector<1x2x32xf32> to vector<2x32xf32>
    %28 = vector.shape_cast %25 : vector<2x32xf32> to vector<1x2x32xf32>
    tpu.vector_store %arg3[%c0_14, %c6, %c0_15], %28 {strides = array<i32>} : memref<1x18x32xf32, #tpu.memory_space<vmem>>, vector<1x2x32xf32>,
    %c4_i32 = arith.constant 4 : i32
    %29 = arith.addi %0, %c4_i32 : i32
    %c0_16 = arith.constant 0 : index
    %30 = arith.index_cast %29 : i32 to index
    %c0_17 = arith.constant 0 : index
    %31 = vector.load %arg2[%c0_16, %30, %c0_17] : memref<1x10x32xf32, #tpu.memory_space<vmem>>, vector<1x2x32xf32>
    %32 = vector.shape_cast %31 : vector<1x2x32xf32> to vector<2x32xf32>
    %c0_18 = arith.constant 0 : index
    %c8 = arith.constant 8 : index
    %c0_19 = arith.constant 0 : index
    %33 = vector.load %arg3[%c0_18, %c8, %c0_19] : memref<1x18x32xf32, #tpu.memory_space<vmem>>, vector<1x2x32xf32>
    %34 = vector.shape_cast %33 : vector<1x2x32xf32> to vector<2x32xf32>
    %35 = vector.shape_cast %32 : vector<2x32xf32> to vector<1x2x32xf32>
    tpu.vector_store %arg3[%c0_18, %c8, %c0_19], %35 {strides = array<i32>} : memref<1x18x32xf32, #tpu.memory_space<vmem>>, vector<1x2x32xf32>,
    %c5_i32 = arith.constant 5 : i32
    %36 = arith.addi %0, %c5_i32 : i32
    %c0_20 = arith.constant 0 : index
    %37 = arith.index_cast %36 : i32 to index
    %c0_21 = arith.constant 0 : index
    %38 = vector.load %arg2[%c0_20, %37, %c0_21] : memref<1x10x32xf32, #tpu.memory_space<vmem>>, vector<1x2x32xf32>
    %39 = vector.shape_cast %38 : vector<1x2x32xf32> to vector<2x32xf32>
    %c0_22 = arith.constant 0 : index
    %c10 = arith.constant 10 : index
    %c0_23 = arith.constant 0 : index
    %40 = vector.load %arg3[%c0_22, %c10, %c0_23] : memref<1x18x32xf32, #tpu.memory_space<vmem>>, vector<1x2x32xf32>
    %41 = vector.shape_cast %40 : vector<1x2x32xf32> to vector<2x32xf32>
    %42 = vector.shape_cast %39 : vector<2x32xf32> to vector<1x2x32xf32>
    tpu.vector_store %arg3[%c0_22, %c10, %c0_23], %42 {strides = array<i32>} : memref<1x18x32xf32, #tpu.memory_space<vmem>>, vector<1x2x32xf32>,
    %c6_i32 = arith.constant 6 : i32
    %43 = arith.addi %0, %c6_i32 : i32
    %c0_24 = arith.constant 0 : index
    %44 = arith.index_cast %43 : i32 to index
    %c0_25 = arith.constant 0 : index
    %45 = vector.load %arg2[%c0_24, %44, %c0_25] : memref<1x10x32xf32, #tpu.memory_space<vmem>>, vector<1x2x32xf32>
    %46 = vector.shape_cast %45 : vector<1x2x32xf32> to vector<2x32xf32>
    %c0_26 = arith.constant 0 : index
    %c12 = arith.constant 12 : index
    %c0_27 = arith.constant 0 : index
    %47 = vector.load %arg3[%c0_26, %c12, %c0_27] : memref<1x18x32xf32, #tpu.memory_space<vmem>>, vector<1x2x32xf32>
    %48 = vector.shape_cast %47 : vector<1x2x32xf32> to vector<2x32xf32>
    %49 = vector.shape_cast %46 : vector<2x32xf32> to vector<1x2x32xf32>
    tpu.vector_store %arg3[%c0_26, %c12, %c0_27], %49 {strides = array<i32>} : memref<1x18x32xf32, #tpu.memory_space<vmem>>, vector<1x2x32xf32>,
    %c7_i32 = arith.constant 7 : i32
    %50 = arith.addi %0, %c7_i32 : i32
    %c0_28 = arith.constant 0 : index
    %51 = arith.index_cast %50 : i32 to index
    %c0_29 = arith.constant 0 : index
    %52 = vector.load %arg2[%c0_28, %51, %c0_29] : memref<1x10x32xf32, #tpu.memory_space<vmem>>, vector<1x2x32xf32>
    %53 = vector.shape_cast %52 : vector<1x2x32xf32> to vector<2x32xf32>
    %c0_30 = arith.constant 0 : index
    %c14 = arith.constant 14 : index
    %c0_31 = arith.constant 0 : index
    %54 = vector.load %arg3[%c0_30, %c14, %c0_31] : memref<1x18x32xf32, #tpu.memory_space<vmem>>, vector<1x2x32xf32>
    %55 = vector.shape_cast %54 : vector<1x2x32xf32> to vector<2x32xf32>
    %56 = vector.shape_cast %53 : vector<2x32xf32> to vector<1x2x32xf32>
    tpu.vector_store %arg3[%c0_30, %c14, %c0_31], %56 {strides = array<i32>} : memref<1x18x32xf32, #tpu.memory_space<vmem>>, vector<1x2x32xf32>,
    %c8_i32 = arith.constant 8 : i32
    %57 = arith.addi %0, %c8_i32 : i32
    %c0_32 = arith.constant 0 : index
    %58 = arith.index_cast %57 : i32 to index
    %c0_33 = arith.constant 0 : index
    %59 = vector.load %arg2[%c0_32, %58, %c0_33] : memref<1x10x32xf32, #tpu.memory_space<vmem>>, vector<1x2x32xf32>
    %60 = vector.shape_cast %59 : vector<1x2x32xf32> to vector<2x32xf32>
    %c0_34 = arith.constant 0 : index
    %c16 = arith.constant 16 : index
    %c0_35 = arith.constant 0 : index
    %61 = vector.load %arg3[%c0_34, %c16, %c0_35] : memref<1x18x32xf32, #tpu.memory_space<vmem>>, vector<1x2x32xf32>
    %62 = vector.shape_cast %61 : vector<1x2x32xf32> to vector<2x32xf32>
    %63 = vector.shape_cast %60 : vector<2x32xf32> to vector<1x2x32xf32>
    tpu.vector_store %arg3[%c0_34, %c16, %c0_35], %63 {strides = array<i32>} : memref<1x18x32xf32, #tpu.memory_space<vmem>>, vector<1x2x32xf32>,
    return
  }
  func.func @transform_0(%arg0: i32, %arg1: i32) -> (i32, i32, i32) {
    %c0_i32 = arith.constant 0 : i32
    %c0_i32_0 = arith.constant 0 : i32
    %c0_i32_1 = arith.constant 0 : i32
    return %arg0, %c0_i32, %c0_i32_0 : i32, i32, i32
  }
  func.func @transform_1(%arg0: i32, %arg1: i32) -> (i32, i32, i32) {
    %c0_i32 = arith.constant 0 : i32
    %c0_i32_0 = arith.constant 0 : i32
    return %arg0, %arg1, %c0_i32 : i32, i32, i32
  }
}

</mosaic_0001>

<bundles_post_ra>
// kernel: tpu_custom_call.1
= control target key start
LH: loop header
LB: loop body
LE: loop exit
PB: predicated region body
PF: predicated region fallthrough
CT: control target
= control target key end

     0   :  { %s362_s6 = smov 0   ;;  %s364_s7 = smov 0   ;;  %s404_s0 = inlined_call_operand.vmem [shape: f32[2,10,32], index: 0, kind: input, shape index: {}]   ;;  %s405_s1 = inlined_call_operand.vmem [shape: f32[2,18,32], index: 1, kind: output, shape index: {}]  }
   0x1   :  { %s366_s8 = smov 0  }
   0x2 LB: > { %s23_s9 = sadd.s32 1, %s346_s7  ;;  %p288_p0 = scmp.ge.s32.totalorder %s350_s8, 1  ;;  %s350_s8 = sphi %s366_s8, %s11_s8   ;;  %s346_s7 = sphi %s364_s7, %s407_s7   ;;  %s342_s6 = sphi %s362_s6, %s406_s6  }
   0x3   : > { %p25_p1 = scmp.ge.s32.totalorder %s23_s9, 2  ;;  %p101_p2 = scmp.lt.s32.totalorder %s350_s8, 3 }
   0x5   : > { %s409_s9 = smov (%p25_p1, %s23_s9), 0  ;;  %p102_p3 = pnand %p288_p0, %p101_p2 }
   0x6   : > { %p125_p4 = scmp.lt.s32.totalorder (!%p102_p3), %s342_s6, 1 }
   0x7   : > { %105 = sbr.rel (%p102_p3) target bundleno = 25 (0x19), region = 24 }
   0xc   : > { %s411_s6 = smov (!%p125_p4, %s342_s6), 1  ;;  %vm143_vm0 = vcmask 254976  }
   0xd   : > { %s302_s10 = sshll.u32 %s411_s6, 4  ;;  %s303_s11 = smul.u32 24, %s411_s6 }
   0xe   : > { %s129_s14 = scalar_lea.vmem %s404_s0, %s302_s10 }
   0xf   : > { %s138_s17 = scalar_lea.vmem %s405_s1, %s303_s11  ;;  %v142_v0 = vld [vmem:[%s129_s14] sm:$0x3]  ;;  %v293_v2 = vld [vmem:[%s129_s14 + $0x2] sm:$0x3]  ;;  %v295_v4 = vld [vmem:[%s129_s14 + $0x4] sm:$0x3] }
  0x10   : > { %v292_v1 = vld [vmem:[%s129_s14 + $0x1] sm:$0x3]  ;;  %144 = vst.msk [vmem:[%s138_s17] sm:$0x3] %vm143_vm0, %v142_v0  ;;  %v294_v3 = vld [vmem:[%s129_s14 + $0x3] sm:$0x3] }
  0x11   : > { %148 = vst.msk [vmem:[%s138_s17 + $0x2] sm:$0x3] %vm143_vm0, %v292_v1  ;;  %v296_v5 = vld [vmem:[%s129_s14 + $0x5] sm:$0x3]  ;;  %v298_v7 = vld [vmem:[%s129_s14 + $0x7] sm:$0x3] }
  0x12   : > { %152 = vst.msk [vmem:[%s138_s17 + $0x4] sm:$0x3] %vm143_vm0, %v293_v2  ;;  %v297_v6 = vld [vmem:[%s129_s14 + $0x6] sm:$0x3]  ;;  %v299_v8 = vld [vmem:[%s129_s14 + $0x8] sm:$0x3] }
  0x13   : > { %156 = vst.msk [vmem:[%s138_s17 + $0x6] sm:$0x3] %vm143_vm0, %v294_v3 }
  0x14   : > { %160 = vst.msk [vmem:[%s138_s17 + $0x8] sm:$0x3] %vm143_vm0, %v295_v4 }
  0x15   : > { %164 = vst.msk [vmem:[%s138_s17 + $0xa] sm:$0x3] %vm143_vm0, %v296_v5 }
  0x16   : > { %168 = vst.msk [vmem:[%s138_s17 + $0xc] sm:$0x3] %vm143_vm0, %v297_v6 }
  0x17   : > { %172 = vst.msk [vmem:[%s138_s17 + $0xe] sm:$0x3] %vm143_vm0, %v298_v7 }
  0x18   : > { %176 = vst.msk [vmem:[%s138_s17 + $0x10] sm:$0x3] %vm143_vm0, %v299_v8 }
  0x19 PF: > { %s11_s8 = sadd.s32 1, %s350_s8   ;;  %s406_s6 = smov %s346_s7 }
  0x1a   : > { %p8_p5 = scmp.ge.s32.totalorder %s11_s8, 4   ;;  %s407_s7 = smov %s409_s9 }
  0x1c   :  { %10 = sbr.rel (!%p8_p5) target bundleno = 2 (0x2), region = 63 }

</bundles_post_ra>
